<compile_context>
chip_gen: v7x
topology: tpu7x:2x2x1
jax: 0.10.0
libtpu: 0.0.40
codegen_flags: <defaults>
</compile_context>

<pallas_src>
import functools

import jax
import jax.numpy as jnp
import numpy as np
from jax import lax
from jax.experimental import pallas as pl
from jax.experimental.pallas import tpu as pltpu


# ----------------------------------------------------------------------------
# In-kernel helpers
# ----------------------------------------------------------------------------
def _hidden_scores(h, w_h_row, use_mxu):
    """s_h[b, l] = hidden[b, l, :] . w_h   for an f32 (Bt, Lt, H) block."""
    if use_mxu:
        # Single (Bt*Lt, H) x (H, 1) matvec on the MXU (frees the XLU on v7x).
        bt, lt, hd = h.shape
        flat = lax.dot_general(h.reshape(bt * lt, hd), w_h_row,
                               (((1,), (1,)), ((), ())),
                               preferred_element_type=jnp.float32)  # (Bt*Lt, 1)
        return flat.reshape(bt, lt)
    # Exact-f32 VPU multiply + lane reduce (default; kernel is HBM-bound).
    return jnp.sum(h * w_h_row[:, None, :], axis=-1)


# ----------------------------------------------------------------------------
# Path A kernel: full-L block per grid step (fits VMEM)
# ----------------------------------------------------------------------------
def _attention_pool_kernel(hidden_ref, mask_ref, pt_ref, w_h_ref, w_t_ref, b_ref,
                           pooled_ref, attn_ref, *, use_mxu_scores):
    # hidden_ref : (Bt, L, H)  native dtype (f32 / bf16), upcast in-register
    # mask_ref   : (Bt, L)     f32 per-token mask value (token_mask[:, :, 0])
    # pt_ref     : (Bt, H)     pooled_tokens, native dtype
    # w_h_ref    : (1, H)      alignment weights applied to masked_hidden
    # w_t_ref    : (1, H)      alignment weights applied to tokens_rep_masked
    # b_ref      : (1, 1)      alignment bias
    # pooled_ref : (Bt, H)     f32
    # attn_ref   : (Bt, L)     f32, lane-dense
    h = hidden_ref[...].astype(jnp.float32)
    m = mask_ref[...]
    pt = pt_ref[...].astype(jnp.float32)

    # scores = m * (hidden . w_h + pooled_tokens . w_t) + b   (mask assumed
    # constant across H — same assumption the module makes via token_mask[:,:,0])
    c = jnp.sum(pt * w_t_ref[...], axis=-1, keepdims=True)          # (Bt, 1)
    s_h = _hidden_scores(h, w_h_ref[...], use_mxu_scores)           # (Bt, L)
    scores = m * (s_h + c) + b_ref[...]                             # (Bt, L)

    # Masked softmax; rows with no valid tokens stay all-zero.
    valid = m != 0.0
    masked_scores = jnp.where(valid, scores, jnp.float32(-1e30))
    mx = jnp.max(masked_scores, axis=-1, keepdims=True)             # (Bt, 1)
    e = jnp.where(valid, jnp.exp(masked_scores - mx), 0.0)
    den = jnp.sum(e, axis=-1, keepdims=True)
    safe_den = jnp.where(den > 0.0, den, 1.0)                       # no 0/0 NaN
    probs = e * pl.reciprocal(safe_den, approx=False)               # exact (1e-5 parity)

    attn_ref[...] = probs.astype(attn_ref.dtype)                    # lane-dense store

    # pooled[b] = sum_L masked_hidden[b] * probs[b]
    w = m * probs
    pooled_ref[...] = jnp.sum(h * w[:, :, None], axis=1).astype(pooled_ref.dtype)


# ----------------------------------------------------------------------------
# Path B kernel: L-tiled, flash-style running softmax (for large L*H / v7x VMEM)
# ----------------------------------------------------------------------------
def _attention_pool_flash_kernel(hidden_ref, mask_ref, pt_ref, w_h_ref, w_t_ref,
                                 b_ref, scores_ref, pooled_ref, mfin_ref, lfin_ref,
                                 m_sc, l_sc, acc_sc, *, use_mxu_scores):
    li = pl.program_id(1)

    @pl.when(li == 0)
    def _():
        m_sc[...] = jnp.full(m_sc.shape, -1e30, jnp.float32)
        l_sc[...] = jnp.zeros(l_sc.shape, jnp.float32)
        acc_sc[...] = jnp.zeros(acc_sc.shape, jnp.float32)

    h = hidden_ref[...].astype(jnp.float32)                          # (Bt, Lt, H)
    m = mask_ref[...]                                                # (Bt, Lt)
    pt = pt_ref[...].astype(jnp.float32)                             # (Bt, H)

    c = jnp.sum(pt * w_t_ref[...], axis=-1, keepdims=True)           # (Bt, 1)
    s_h = _hidden_scores(h, w_h_ref[...], use_mxu_scores)            # (Bt, Lt)
    scores = m * (s_h + c) + b_ref[...]
    valid = m != 0.0
    masked_scores = jnp.where(valid, scores, jnp.float32(-1e30))
    # Raw masked scores; global normalization is finished on the tiny (B, L)
    # array in the wrapper with the final (m, l) running statistics.
    scores_ref[...] = masked_scores

    blk_max = jnp.max(masked_scores, axis=-1, keepdims=True)         # (Bt, 1)
    m_new = jnp.maximum(m_sc[...], blk_max)
    alpha = jnp.exp(m_sc[...] - m_new)
    e = jnp.where(valid, jnp.exp(masked_scores - m_new), 0.0)
    l_sc[...] = alpha * l_sc[...] + jnp.sum(e, axis=-1, keepdims=True)
    w = m * e
    acc_sc[...] = alpha * acc_sc[...] + jnp.sum(h * w[:, :, None], axis=1)
    m_sc[...] = m_new

    @pl.when(li == pl.num_programs(1) - 1)
    def _():
        den = l_sc[...]
        safe_den = jnp.where(den > 0.0, den, 1.0)
        pooled_ref[...] = (acc_sc[...] * pl.reciprocal(safe_den, approx=False)
                           ).astype(pooled_ref.dtype)
        mfin_ref[...] = m_sc[...]
        lfin_ref[...] = safe_den


def _project_kernel(x_ref, w_ref, b_ref, out_ref):
    # output_layer: Tanh(Linear(insize, outsize))
    y = jnp.dot(x_ref[...], w_ref[...], preferred_element_type=jnp.float32) + b_ref[...]
    out_ref[...] = jnp.tanh(y).astype(out_ref.dtype)


# ----------------------------------------------------------------------------
# Tile sizing helpers (per-generation VMEM budgeting)
# ----------------------------------------------------------------------------
def _vmem_capacity_bytes():
    try:
        return int(pltpu.get_tpu_info().vmem_capacity_bytes)
    except Exception:
        return 64 << 20   # conservative default (v7x physical VMEM)


def _hidden_budget(vmem_capacity):
    # 128 MiB chips (v5e/v6e) can give the hidden stream a larger share; 64 MiB
    # (v7x) keeps more headroom for the double-buffered blocks + compiler scratch.
    if vmem_capacity >= (96 << 20):
        return vmem_capacity // 4
    return vmem_capacity // 6


def _batch_tile_candidates(B):
    # (Bt, L)/(Bt, H) 2-D blocks need Bt % 8 == 0 unless Bt == B (full dim).
    return [bt for bt in range(1, B + 1)
            if B % bt == 0 and (bt == B or bt % 8 == 0)]


def _choose_batch_tile(B, bytes_per_row, budget):
    """Largest legal batch tile whose double-buffered hidden block fits; None if none."""
    cands = _batch_tile_candidates(B)
    cap = budget // (2 * max(1, bytes_per_row))          # hidden is double-buffered
    fitting = [bt for bt in cands if bt <= cap]
    if not fitting:
        return None
    # Prefer >=2 grid steps so megacore can shard the parallel batch axis.
    multi = [bt for bt in fitting if B // bt >= 2]
    return max(multi) if multi else max(fitting)


def _auto_l_tile(B, L, H, itemsize, budget):
    """Largest multiple-of-128 L tile (lane-dense blocks) that fits; None if L can't tile."""
    lts = [v for v in range(128, L, 128) if L % v == 0]
    if not lts:
        return None
    for v in sorted(lts, reverse=True):
        if _choose_batch_tile(B, v * H * itemsize, budget) is not None:
            return v
    return min(lts)


def _vmem_limit_bytes(block_bytes, vmem_capacity):
    need = 2 * block_bytes + (8 << 20)                   # double-buffer + compiler slack
    return int(min(int(0.9 * vmem_capacity), max(need, 32 << 20)))


# ----------------------------------------------------------------------------
# Forward wrapper
# ----------------------------------------------------------------------------
def attention_entity_pooler_forward(hidden, token_mask, pooled_tokens, params,
                                    *, use_mxu_scores=False, l_block=None):
    """Forward of BaseAttentionEntityPooler (softmax attention pooling).

    hidden        : (B, L, H) in its native dtype (f32 or bf16; streamed as-is)
    token_mask    : (B, L), (B, L, 1) or the module's broadcast (B, L, H)
    pooled_tokens : (B, H) in its native dtype
    """
    B, L, H = hidden.shape
    insize = H
    outsize = params["w_out"].shape[0]

    # Accept a compact per-token mask; the module only uses token_mask[:, :, 0]
    # and assumes the value is constant across H.
    if token_mask.ndim == 3:
        assert token_mask.shape[:2] == (B, L)
        mask_tok = token_mask[:, :, 0]
    else:
        assert token_mask.shape == (B, L)
        mask_tok = token_mask
    mask_tok = mask_tok.astype(jnp.float32)

    # alignment_model: Linear(2*outsize, 1) -> weight (1, 2*H), bias (1,)
    w_align = params["w_align"].astype(jnp.float32)
    w_t = w_align[:, :insize]                       # (1, H) applied to tokens_rep_masked
    w_h = w_align[:, insize:2 * insize]             # (1, H) applied to masked_hidden
    b_align = params["b_align"].reshape(1, 1).astype(jnp.float32)

    itemsize = jnp.dtype(hidden.dtype).itemsize
    vmem = _vmem_capacity_bytes()
    budget = _hidden_budget(vmem)
    cands = _batch_tile_candidates(B)

    # --- choose tiling path -------------------------------------------------
    bt_full = _choose_batch_tile(B, L * H * itemsize, budget)
    lt = None
    if (l_block is not None and 0 < l_block < L and L % l_block == 0
            and l_block % 128 == 0):
        lt = l_block                                                  # forced L tiling
    elif bt_full is None and L % 128 == 0 and L // 128 >= 2:
        lt = _auto_l_tile(B, L, H, itemsize, budget)                  # VMEM-driven L tiling

    if lt is not None:
        bt = _choose_batch_tile(B, lt * H * itemsize, budget) or min(cands)
    else:
        # TODO(synk): if L is not a multiple of 128 no lane-dense L tiling is
        # possible; fall back to the smallest legal batch tile.
        bt = bt_full if bt_full is not None else min(cands)

    if lt is None:
        # ---------------- Path A: full-L block ----------------
        block_bytes = (bt * L * H * itemsize            # hidden
                       + bt * L * 8                     # mask in + attn out
                       + bt * H * (itemsize + 4)        # pooled_tokens in + pooled out
                       + 2 * H * 4 + 4)                 # weights + bias
        pooled, attn2d = pl.pallas_call(
            functools.partial(_attention_pool_kernel, use_mxu_scores=use_mxu_scores),
            out_shape=(jax.ShapeDtypeStruct((B, H), jnp.float32),
                       jax.ShapeDtypeStruct((B, L), jnp.float32)),
            grid=(B // bt,),
            in_specs=[
                pl.BlockSpec((bt, L, H), lambda i: (i, 0, 0)),   # hidden (native dtype)
                pl.BlockSpec((bt, L), lambda i: (i, 0)),         # per-token mask
                pl.BlockSpec((bt, H), lambda i: (i, 0)),         # pooled_tokens
                pl.BlockSpec((1, H), lambda i: (0, 0)),          # w_h
                pl.BlockSpec((1, H), lambda i: (0, 0)),          # w_t
                pl.BlockSpec((1, 1), lambda i: (0, 0)),          # bias
            ],
            out_specs=(
                pl.BlockSpec((bt, H), lambda i: (i, 0)),         # pooled (lane-dense)
                pl.BlockSpec((bt, L), lambda i: (i, 0)),         # attn probs (lane-dense)
            ),
            compiler_params=pltpu.CompilerParams(
                dimension_semantics=("parallel",),
                vmem_limit_bytes=_vmem_limit_bytes(block_bytes, vmem),
            ),
        )(hidden, mask_tok, pooled_tokens, w_h, w_t, b_align)
    else:
        # ---------------- Path B: L-tiled flash-style softmax ----------------
        nl = L // lt
        block_bytes = (bt * lt * H * itemsize
                       + bt * lt * 8                    # mask in + scores out
                       + bt * H * (itemsize + 8)        # pt in + pooled out + acc scratch
                       + bt * 16                        # m/l scratch + m/l out
                       + 2 * H * 4 + 4)
        scores, pooled, m_fin, l_fin = pl.pallas_call(
            functools.partial(_attention_pool_flash_kernel,
                              use_mxu_scores=use_mxu_scores),
            out_shape=(jax.ShapeDtypeStruct((B, L), jnp.float32),
                       jax.ShapeDtypeStruct((B, H), jnp.float32),
                       jax.ShapeDtypeStruct((B, 1), jnp.float32),
                       jax.ShapeDtypeStruct((B, 1), jnp.float32)),
            grid=(B // bt, nl),
            in_specs=[
                pl.BlockSpec((bt, lt, H), lambda i, j: (i, j, 0)),
                pl.BlockSpec((bt, lt), lambda i, j: (i, j)),
                pl.BlockSpec((bt, H), lambda i, j: (i, 0)),
                pl.BlockSpec((1, H), lambda i, j: (0, 0)),
                pl.BlockSpec((1, H), lambda i, j: (0, 0)),
                pl.BlockSpec((1, 1), lambda i, j: (0, 0)),
            ],
            out_specs=(
                pl.BlockSpec((bt, lt), lambda i, j: (i, j)),     # raw masked scores
                pl.BlockSpec((bt, H), lambda i, j: (i, 0)),      # pooled (accumulator)
                pl.BlockSpec((bt, 1), lambda i, j: (i, 0)),      # running max (final)
                pl.BlockSpec((bt, 1), lambda i, j: (i, 0)),      # softmax denom (final)
            ),
            scratch_shapes=[
                pltpu.VMEM((bt, 1), jnp.float32),                # m
                pltpu.VMEM((bt, 1), jnp.float32),                # l
                pltpu.VMEM((bt, H), jnp.float32),                # weighted-pool acc
            ],
            compiler_params=pltpu.CompilerParams(
                dimension_semantics=("parallel", "arbitrary"),
                vmem_limit_bytes=_vmem_limit_bytes(block_bytes, vmem),
            ),
        )(hidden, mask_tok, pooled_tokens, w_h, w_t, b_align)
        # Global softmax normalization over L blocks: only touches the tiny
        # (B, L) score array — negligible vs. the hidden stream.
        valid2d = mask_tok != 0.0
        attn2d = jnp.where(valid2d, jnp.exp(scores - m_fin), 0.0) / l_fin

    attn = attn2d[:, :, None]   # module returns attention_probs as [B, L, 1]

    if outsize == insize:
        projected = pooled
    else:
        # TODO(synk): unreachable with dimensionally-consistent params (the
        # alignment model Linear(2*outsize, 1) implies insize == outsize); kept
        # with a simple batch-tiled grid for completeness only.
        bt_p = _choose_batch_tile(B, 4 * max(insize, outsize), budget) or min(cands)
        projected = pl.pallas_call(
            _project_kernel,
            out_shape=jax.ShapeDtypeStruct((B, outsize), jnp.float32),
            grid=(B // bt_p,),
            in_specs=[
                pl.BlockSpec((bt_p, insize), lambda i: (i, 0)),
                pl.BlockSpec((insize, outsize), lambda i: (0, 0)),
                pl.BlockSpec((1, outsize), lambda i: (0, 0)),
            ],
            out_specs=pl.BlockSpec((bt_p, outsize), lambda i: (i, 0)),
            compiler_params=pltpu.CompilerParams(
                dimension_semantics=("parallel",)),
        )(pooled, params["w_out"].T.astype(jnp.float32),
          params["b_out"].reshape(1, outsize).astype(jnp.float32))

    return projected, attn


# ----------------------------------------------------------------------------
# Pure-JAX reference (matches the PyTorch module; f32 math on upcast inputs)
# ----------------------------------------------------------------------------
def reference_forward(hidden, mask2d, pooled_tokens, params):
    hidden = hidden.astype(jnp.float32)
    pooled_tokens = pooled_tokens.astype(jnp.float32)
    token_mask = jnp.broadcast_to(mask2d[:, :, None].astype(jnp.float32), hidden.shape)
    masked_hidden = hidden * token_mask
    tok_rep_masked = pooled_tokens[:, None, :] * token_mask
    align_in = jnp.concatenate([tok_rep_masked, masked_hidden], axis=-1)
    scores = (jnp.sum(align_in * params["w_align"][0].astype(jnp.float32),
                      axis=-1, keepdims=True)
              + params["b_align"].astype(jnp.float32))               # (B, L, 1)
    valid = token_mask[:, :, 0:1] != 0.0
    masked_scores = jnp.where(valid, scores, -1e30)
    mx = jnp.max(masked_scores, axis=1, keepdims=True)
    e = jnp.where(valid, jnp.exp(masked_scores - mx), 0.0)
    den = jnp.sum(e, axis=1, keepdims=True)
    probs = jnp.where(den > 0.0, e / jnp.where(den > 0.0, den, 1.0), 0.0)
    pooled = jnp.sum(masked_hidden * probs, axis=1)
    insize = hidden.shape[-1]
    outsize = params["w_out"].shape[0]
    if outsize == insize:
        projected = pooled
    else:
        projected = jnp.tanh(pooled @ params["w_out"].T.astype(jnp.float32)
                             + params["b_out"].astype(jnp.float32))
    return projected, probs


def make_params(insize, outsize, key):
    k1, k2, k3, k4 = jax.random.split(key, 4)
    bo = 1.0 / np.sqrt(insize)
    ba = 1.0 / np.sqrt(2 * outsize)
    return {
        # output_layer: Linear(insize, outsize)
        "w_out": jax.random.uniform(k1, (outsize, insize), jnp.float32, -bo, bo),
        "b_out": jax.random.uniform(k2, (outsize,), jnp.float32, -bo, bo),
        # alignment_model: Linear(2 * outsize, 1)
        "w_align": jax.random.uniform(k3, (1, 2 * outsize), jnp.float32, -ba, ba),
        "b_align": jax.random.uniform(k4, (1,), jnp.float32, -ba, ba),
    }


if __name__ == "__main__":
    key = jax.random.PRNGKey(0)
    kh, kp, kparam, kh2, kp2 = jax.random.split(key, 5)

    # H lane-aligned; the alignment model Linear(2*outsize, 1) implies insize == outsize.
    B, L, H = 8, 16, 128
    params = make_params(H, H, kparam)

    hidden = jax.random.normal(kh, (B, L, H), dtype=jnp.float32)
    pooled_tokens = jax.random.normal(kp, (B, H), dtype=jnp.float32)
    lengths = jnp.array([5, 16, 0, 16, 3, 8, 1, 12])      # includes empty + 1-token entities
    mask2d = (jnp.arange(L)[None, :] < lengths[:, None]).astype(jnp.float32)

    # --- Case 1: f32 activations, full-L path ---
    proj, attn = attention_entity_pooler_forward(hidden, mask2d, pooled_tokens, params)
    jax.block_until_ready((proj, attn))
    rproj, rattn = reference_forward(hidden, mask2d, pooled_tokens, params)
    np.testing.assert_allclose(np.asarray(proj), np.asarray(rproj), rtol=1e-5, atol=1e-5)
    np.testing.assert_allclose(np.asarray(attn), np.asarray(rattn), rtol=1e-5, atol=1e-5)

    # --- Case 2: bf16 activations streamed natively (upcast in-kernel is exact) ---
    hidden_bf = hidden.astype(jnp.bfloat16)
    pooled_bf = pooled_tokens.astype(jnp.bfloat16)
    proj_bf, attn_bf = attention_entity_pooler_forward(hidden_bf, mask2d, pooled_bf, params)
    jax.block_until_ready((proj_bf, attn_bf))
    rproj_bf, rattn_bf = reference_forward(hidden_bf, mask2d, pooled_bf, params)
    np.testing.assert_allclose(np.asarray(proj_bf), np.asarray(rproj_bf), rtol=1e-5, atol=1e-5)
    np.testing.assert_allclose(np.asarray(attn_bf), np.asarray(rattn_bf), rtol=1e-5, atol=1e-5)

    # --- Case 3: L-tiled flash-style path (forced via l_block) ---
    B3, L3 = 8, 256
    hidden3 = jax.random.normal(kh2, (B3, L3, H), dtype=jnp.float32)
    pooled3 = jax.random.normal(kp2, (B3, H), dtype=jnp.float32)
    lengths3 = jnp.array([0, 256, 17, 130, 3, 200, 1, 128])
    mask3 = (jnp.arange(L3)[None, :] < lengths3[:, None]).astype(jnp.float32)
    proj3, attn3 = attention_entity_pooler_forward(hidden3, mask3, pooled3, params,
                                                   l_block=128)
    jax.block_until_ready((proj3, attn3))
    rproj3, rattn3 = reference_forward(hidden3, mask3, pooled3, params)
    np.testing.assert_allclose(np.asarray(proj3), np.asarray(rproj3), rtol=1e-5, atol=1e-5)
    np.testing.assert_allclose(np.asarray(attn3), np.asarray(rattn3), rtol=1e-5, atol=1e-5)

    # --- Case 4: the module's original (B, L, H) broadcast mask API still works ---
    mask3d = jnp.broadcast_to(mask2d[:, :, None], (B, L, H))
    proj4, attn4 = attention_entity_pooler_forward(hidden, mask3d, pooled_tokens, params)
    jax.block_until_ready((proj4, attn4))
    np.testing.assert_allclose(np.asarray(proj4), np.asarray(rproj), rtol=1e-5, atol=1e-5)
    np.testing.assert_allclose(np.asarray(attn4), np.asarray(rattn), rtol=1e-5, atol=1e-5)

    print("KERNEL_OK")
</pallas_src>

<mosaic_0001>
module attributes {stable_mosaic.version = 11 : i64} {
  func.func @_attention_pool_kernel(%arg0: i32, %arg1: memref<8x16x128xf32, #tpu.memory_space<vmem>>, %arg2: memref<8x16xf32, #tpu.memory_space<vmem>>, %arg3: memref<8x128xf32, #tpu.memory_space<vmem>>, %arg4: memref<1x128xf32, #tpu.memory_space<vmem>>, %arg5: memref<1x128xf32, #tpu.memory_space<vmem>>, %arg6: memref<1x1xf32, #tpu.memory_space<vmem>>, %arg7: memref<8x128xf32, #tpu.memory_space<vmem>>, %arg8: memref<8x16xf32, #tpu.memory_space<vmem>>) attributes {dimension_semantics = [#tpu.dimension_semantics<parallel>], iteration_bounds = array<i64: 1>, scalar_prefetch = 0 : i64, scratch_operands = 0 : i64, tpu.core_type = #tpu.core_type<tc>, window_params = [{transform_indices = @transform_0, window_bounds = array<i64: 8, 16, 128>}, {transform_indices = @transform_1, window_bounds = array<i64: 8, 16>}, {transform_indices = @transform_2, window_bounds = array<i64: 8, 128>}, {pipeline_mode = #tpu.pipeline_mode<synchronous>, transform_indices = @transform_3, window_bounds = array<i64: 1, 128>}, {pipeline_mode = #tpu.pipeline_mode<synchronous>, transform_indices = @transform_4, window_bounds = array<i64: 1, 128>}, {pipeline_mode = #tpu.pipeline_mode<synchronous>, transform_indices = @transform_5, window_bounds = array<i64: 1, 1>}, {transform_indices = @transform_6, window_bounds = array<i64: 8, 128>}, {transform_indices = @transform_7, window_bounds = array<i64: 8, 16>}]} {
    %c0 = arith.constant 0 : index
    %c0_0 = arith.constant 0 : index
    %c0_1 = arith.constant 0 : index
    %0 = vector.load %arg1[%c0, %c0_0, %c0_1] : memref<8x16x128xf32, #tpu.memory_space<vmem>>, vector<8x16x128xf32>
    %c0_2 = arith.constant 0 : index
    %c0_3 = arith.constant 0 : index
    %1 = vector.load %arg2[%c0_2, %c0_3] : memref<8x16xf32, #tpu.memory_space<vmem>>, vector<8x16xf32>
    %c0_4 = arith.constant 0 : index
    %c0_5 = arith.constant 0 : index
    %2 = vector.load %arg3[%c0_4, %c0_5] : memref<8x128xf32, #tpu.memory_space<vmem>>, vector<8x128xf32>
    %c0_6 = arith.constant 0 : index
    %c0_7 = arith.constant 0 : index
    %3 = vector.load %arg5[%c0_6, %c0_7] : memref<1x128xf32, #tpu.memory_space<vmem>>, vector<1x128xf32>
    %4 = vector.broadcast %3 : vector<1x128xf32> to vector<8x128xf32>
    %5 = arith.mulf %2, %4 : vector<8x128xf32>
    %cst = arith.constant dense<0.000000e+00> : vector<8xf32>
    %6 = vector.multi_reduction <add>, %5, %cst [1] : vector<8x128xf32> to vector<8xf32>
    %7 = vector.shape_cast %6 : vector<8xf32> to vector<8x1xf32>
    %c0_8 = arith.constant 0 : index
    %c0_9 = arith.constant 0 : index
    %8 = vector.load %arg4[%c0_8, %c0_9] : memref<1x128xf32, #tpu.memory_space<vmem>>, vector<1x128xf32>
    %9 = vector.shape_cast %8 : vector<1x128xf32> to vector<1x1x128xf32>
    %10 = vector.broadcast %9 : vector<1x1x128xf32> to vector<8x16x128xf32>
    %11 = arith.mulf %0, %10 : vector<8x16x128xf32>
    %cst_10 = arith.constant dense<0.000000e+00> : vector<8x16xf32>
    %12 = vector.multi_reduction <add>, %11, %cst_10 [2] : vector<8x16x128xf32> to vector<8x16xf32>
    %13 = vector.broadcast %7 : vector<8x1xf32> to vector<8x16xf32>
    %14 = arith.addf %12, %13 : vector<8x16xf32>
    %15 = arith.mulf %1, %14 : vector<8x16xf32>
    %c0_11 = arith.constant 0 : index
    %c0_12 = arith.constant 0 : index
    %16 = vector.load %arg6[%c0_11, %c0_12] : memref<1x1xf32, #tpu.memory_space<vmem>>, vector<1x1xf32>
    %17 = vector.broadcast %16 : vector<1x1xf32> to vector<8x16xf32>
    %18 = arith.addf %15, %17 : vector<8x16xf32>
    %cst_13 = arith.constant 0.000000e+00 : f32
    %19 = vector.broadcast %cst_13 : f32 to vector<8x16xf32>
    %20 = arith.cmpf one, %1, %19 : vector<8x16xf32>
    %cst_14 = arith.constant -1.000000e+30 : f32
    %21 = vector.broadcast %cst_14 : f32 to vector<8x16xf32>
    %22 = arith.select %20, %18, %21 : vector<8x16xi1>, vector<8x16xf32>
    %cst_15 = arith.constant dense<0xFF800000> : vector<8xf32>
    %23 = vector.multi_reduction <maximumf>, %22, %cst_15 [1] : vector<8x16xf32> to vector<8xf32>
    %24 = vector.shape_cast %23 : vector<8xf32> to vector<8x1xf32>
    %25 = vector.broadcast %24 : vector<8x1xf32> to vector<8x16xf32>
    %26 = arith.subf %22, %25 : vector<8x16xf32>
    %27 = math.exp %26 : vector<8x16xf32>
    %cst_16 = arith.constant 0.000000e+00 : f32
    %28 = vector.broadcast %cst_16 : f32 to vector<8x16xf32>
    %29 = arith.select %20, %27, %28 : vector<8x16xi1>, vector<8x16xf32>
    %cst_17 = arith.constant dense<0.000000e+00> : vector<8xf32>
    %30 = vector.multi_reduction <add>, %29, %cst_17 [1] : vector<8x16xf32> to vector<8xf32>
    %31 = vector.shape_cast %30 : vector<8xf32> to vector<8x1xf32>
    %cst_18 = arith.constant 0.000000e+00 : f32
    %32 = vector.broadcast %cst_18 : f32 to vector<8x1xf32>
    %33 = arith.cmpf ogt, %31, %32 : vector<8x1xf32>
    %cst_19 = arith.constant 1.000000e+00 : f32
    %34 = vector.broadcast %cst_19 : f32 to vector<8x1xf32>
    %35 = arith.select %33, %31, %34 : vector<8x1xi1>, vector<8x1xf32>
    %36 = tpu.reciprocal %35 : vector<8x1xf32> -> vector<8x1xf32>
    %37 = vector.broadcast %36 : vector<8x1xf32> to vector<8x16xf32>
    %38 = arith.mulf %29, %37 : vector<8x16xf32>
    %c0_20 = arith.constant 0 : index
    %c0_21 = arith.constant 0 : index
    %39 = vector.load %arg8[%c0_20, %c0_21] : memref<8x16xf32, #tpu.memory_space<vmem>>, vector<8x16xf32>
    tpu.vector_store %arg8[%c0_20, %c0_21], %38 {strides = array<i32>} : memref<8x16xf32, #tpu.memory_space<vmem>>, vector<8x16xf32>,
    %40 = arith.mulf %1, %38 : vector<8x16xf32>
    %41 = vector.shape_cast %40 : vector<8x16xf32> to vector<8x16x1xf32>
    %42 = vector.broadcast %41 : vector<8x16x1xf32> to vector<8x16x128xf32>
    %43 = arith.mulf %0, %42 : vector<8x16x128xf32>
    %cst_22 = arith.constant dense<0.000000e+00> : vector<8x128xf32>
    %44 = vector.multi_reduction <add>, %43, %cst_22 [1] : vector<8x16x128xf32> to vector<8x128xf32>
    %c0_23 = arith.constant 0 : index
    %c0_24 = arith.constant 0 : index
    %45 = vector.load %arg7[%c0_23, %c0_24] : memref<8x128xf32, #tpu.memory_space<vmem>>, vector<8x128xf32>
    tpu.vector_store %arg7[%c0_23, %c0_24], %44 {strides = array<i32>} : memref<8x128xf32, #tpu.memory_space<vmem>>, vector<8x128xf32>,
    return
  }
  func.func @transform_0(%arg0: i32) -> (i32, i32, i32) {
    %c0_i32 = arith.constant 0 : i32
    %c0_i32_0 = arith.constant 0 : i32
    %c0_i32_1 = arith.constant 0 : i32
    return %arg0, %c0_i32, %c0_i32_0 : i32, i32, i32
  }
  func.func @transform_1(%arg0: i32) -> (i32, i32) {
    %c0_i32 = arith.constant 0 : i32
    %c0_i32_0 = arith.constant 0 : i32
    return %arg0, %c0_i32 : i32, i32
  }
  func.func @transform_2(%arg0: i32) -> (i32, i32) {
    %c0_i32 = arith.constant 0 : i32
    %c0_i32_0 = arith.constant 0 : i32
    return %arg0, %c0_i32 : i32, i32
  }
  func.func @transform_3(%arg0: i32) -> (i32, i32) {
    %c0_i32 = arith.constant 0 : i32
    %c0_i32_0 = arith.constant 0 : i32
    %c0_i32_1 = arith.constant 0 : i32
    return %c0_i32, %c0_i32_0 : i32, i32
  }
  func.func @transform_4(%arg0: i32) -> (i32, i32) {
    %c0_i32 = arith.constant 0 : i32
    %c0_i32_0 = arith.constant 0 : i32
    %c0_i32_1 = arith.constant 0 : i32
    return %c0_i32, %c0_i32_0 : i32, i32
  }
  func.func @transform_5(%arg0: i32) -> (i32, i32) {
    %c0_i32 = arith.constant 0 : i32
    %c0_i32_0 = arith.constant 0 : i32
    %c0_i32_1 = arith.constant 0 : i32
    return %c0_i32, %c0_i32_0 : i32, i32
  }
  func.func @transform_6(%arg0: i32) -> (i32, i32) {
    %c0_i32 = arith.constant 0 : i32
    %c0_i32_0 = arith.constant 0 : i32
    return %arg0, %c0_i32 : i32, i32
  }
  func.func @transform_7(%arg0: i32) -> (i32, i32) {
    %c0_i32 = arith.constant 0 : i32
    %c0_i32_0 = arith.constant 0 : i32
    return %arg0, %c0_i32 : i32, i32
  }
}

</mosaic_0001>

<bundles_post_ra>
// kernel: tpu_custom_call.1
= control target key start
LH: loop header
LB: loop body
LE: loop exit
PB: predicated region body
PF: predicated region fallthrough
CT: control target
= control target key end

     0   :  { %s942_s0 = inlined_call_operand.hbm [shape: f32[8,16,128], index: 0, kind: input, shape index: {}]   ;;  %s943_s1 = inlined_call_operand.hbm [shape: f32[8,16], index: 1, kind: input, shape index: {}]   ;;  %s944_s2 = inlined_call_operand.vmem [shape: f32[8,128], index: 2, kind: input, shape index: {}]   ;;  %s945_s3 = inlined_call_operand.vmem [shape: f32[1,128], index: 3, kind: input, shape index: {}]   ;;  %s946_s4 = inlined_call_operand.vmem [shape: f32[1,128], index: 4, kind: input, shape index: {}]   ;;  %s947_s5 = inlined_call_operand.<no memory space> [shape: f32[1,1], index: 5, kind: input, shape index: {}]   ;;  %s948_s6 = inlined_call_operand.hbm [shape: f32[8,128], index: 6, kind: output, shape index: {0}]   ;;  %s949_s7 = inlined_call_operand.hbm [shape: f32[8,16], index: 7, kind: output, shape index: {1}]  }
   0x1   :  { %v13_v0 = vstv %s947_s5 }
   0x2   :  { %14 = vst [vmem:[#allocation2] sm:$0x1] %v13_v0 }
   0x3   :  { %15 = vsyncpa [#allocation4], 0 }
   0x4   :  { %16 = vsyncpa [#allocation7], 0 }
   0x5   :  { %17 = vsyncpa [#allocation5], 0 }
   0x6   :  { %18 = vsyncpa [#allocation10], 0  ;;  %s700_s26 = smov [#allocation3]   ;;  %s604_s30 = scalar_lea.hbm %s942_s0, 2048 }
   0x7   :  { %s24_s27 = sshll.u32 %s700_s26, 4  ;;  %p605_p0 = scmp.ne.s32.totalorder %s942_s0, %s604_s30  ;;  %s25_s27 = int_to_ptr.vmem [resolvable:$true] %s24_s27 }
   0x8   :  { %p608_p1 = scmp.lt.u32.totalorder %s604_s30, %s942_s0 }
   0xa   :  { %p610_p2 = pnand %p608_p1, %p605_p0 }
   0xc   :  { %613 = shalt.err (!%p610_p2)
}
   0xd   :  { %s614_s5 = scalar_lea.vmem %s25_s27, 2048  ;;  %p619_p4 = scmp.lt.s32.totalorder %s25_s27, %s25_s27 }
   0xe   :  { %p615_p3 = scmp.ne.s32.totalorder %s25_s27, %s614_s5  ;;  %p620_p5 = scmp.lt.s32.totalorder %s614_s5, %s614_s5 }
  0x10   :  { %p621_p6 = por %p620_p5, %p619_p4 }
  0x12   :  { %p622_p7 = pnand %p621_p6, %p615_p3 }
  0x14   :  { %625 = shalt.err (!%p622_p7)
}
  0x15   :  { %s701_s12 = smov 128   ;;  %s702_s13 = smov 8  }
  0x16   :  { %30 = dma.hbm_to_vmem [thread:$0]  %s942_s0, 2048, %s25_s27, [#allocation4], %s701_s12, %s701_s12, %s702_s13  }
  0x17   :  { %s703_s16 = smov [#allocation6]   ;;  %s626_s20 = scalar_lea.hbm %s943_s1, 128 }
  0x18   :  { %s37_s17 = sshll.u32 %s703_s16, 4  ;;  %p627_p8 = scmp.ne.s32.totalorder %s943_s1, %s626_s20  ;;  %s38_s17 = int_to_ptr.vmem [resolvable:$true] %s37_s17 }
  0x19   :  { %p630_p9 = scmp.lt.u32.totalorder %s626_s20, %s943_s1 }
  0x1b   :  { %p632_p10 = pnand %p630_p9, %p627_p8 }
  0x1d   :  { %635 = shalt.err (!%p632_p10)
}
  0x1e   :  { %s636_s25 = scalar_lea.vmem %s38_s17, 128  ;;  %p641_p12 = scmp.lt.s32.totalorder %s38_s17, %s38_s17 }
  0x1f   :  { %p637_p11 = scmp.ne.s32.totalorder %s38_s17, %s636_s25  ;;  %p642_p13 = scmp.lt.s32.totalorder %s636_s25, %s636_s25 }
  0x21   :  { %p643_p0 = por %p642_p13, %p641_p12 }
  0x23   :  { %p644_p1 = pnand %p643_p0, %p637_p11 }
  0x25   :  { %647 = shalt.err (!%p644_p1)
}
  0x26   :  { %40 = dma.hbm_to_vmem [thread:$0]  %s943_s1, 128, %s38_s17, [#allocation7]  }
  0x27   :  { %692 = dma.done.wait [#allocation4], 2048  }
  0x28   :  { %693 = vsyncadd [#allocation4], 4294965248 }
  0x29   :  { %694 = dma.done.wait [#allocation7], 128  }
  0x2a   :  { %695 = vsyncadd [#allocation7], 4294967168  ;;  %v72_v1 = vld [vmem:[%s944_s2] sm:$0xff]  ;;  %v780_v3 = vld [vmem:[#allocation3 + $0x8] sm:$0xff]  ;;  %v704_v28 = vmov 0   ;;  %v139_v38 = vlaneseq  ;;  %vm270_vm0 = vcmask 130112  }
  0x2b   :  { %v588_v2 = vld [vmem:[%s946_s4] ss:$0 sm:$0xff]  ;;  %v785_v6 = vld [vmem:[#allocation3 + $0x10] sm:$0xff]  ;;  %v787_v7 = vld [vmem:[#allocation3] sm:$0xff]  ;;  %599 = vset.pattern.permute.xlu0 %v704_v28  ;;  %598 = vset.pattern.permute.xlu1 %v704_v28  ;;  %vm335_vm1 = vcmask 1041409   ;;  %vm337_vm2 = vcmask 1042434  }
  0x2c   :  { %v80_v4 = vmul.f32 %v588_v2, %v72_v1  ;;  %v589_v5 = vld [vmem:[%s945_s3] ss:$0 sm:$0xff]  ;;  %v794_v12 = vld [vmem:[#allocation3 + $0x20] sm:$0xff]  ;;  %v798_v15 = vld [vmem:[#allocation3 + $0x28] sm:$0xff]  ;;  %v832_v39 = vshrl.u32 %v139_v38, 7  ;;  %vm339_vm3 = vcmask 1043459  }
  0x2d   :  { %v91_v8 = vmul.f32 %v589_v5, %v780_v3  ;;  %v90_v9 = vmul.f32 %v589_v5, %v787_v7  ;;  %v92_v10 = vmul.f32 %v589_v5, %v785_v6  ;;  %v792_v11 = vld [vmem:[#allocation3 + $0x18] sm:$0xff]  ;;  %v94_v14 = vmul.f32 %v589_v5, %v794_v12  ;;  %v800_v16 = vld [vmem:[#allocation3 + $0x30] sm:$0xff]  ;;  %v806_v20 = vld [vmem:[#allocation3 + $0x40] sm:$0xff]  ;;  %s705_s1 = smov [#allocation9]  }
  0x2e   :  { %81 = vadd.xlane.f32.xlu0 %v80_v4  ;;  %v93_v13 = vmul.f32 %v589_v5, %v792_v11  ;;  %v95_v17 = vmul.f32 %v589_v5, %v798_v15  ;;  %v96_v18 = vmul.f32 %v589_v5, %v800_v16  ;;  %v804_v19 = vld [vmem:[#allocation3 + $0x38] sm:$0xff]  ;;  %v98_v22 = vmul.f32 %v589_v5, %v806_v20  ;;  %v810_v23 = vld [vmem:[#allocation3 + $0x48] sm:$0xff]  ;;  %v812_v24 = vld [vmem:[#allocation3 + $0x50] sm:$0xff]  ;;  %s574_s2 = sshll.u32 %s705_s1, 4  ;;  %s575_s2 = int_to_ptr.vmem [resolvable:$true] %s574_s2 }
  0x2f   :  { %108 = vadd.xlane.f32.xlu1 %v91_v8  ;;  %v97_v21 = vmul.f32 %v589_v5, %v804_v19  ;;  %v99_v25 = vmul.f32 %v589_v5, %v810_v23  ;;  %v100_v26 = vmul.f32 %v589_v5, %v812_v24  ;;  %v816_v27 = vld [vmem:[#allocation3 + $0x58] sm:$0xff]  ;;  %v818_v29 = vld [vmem:[#allocation3 + $0x60] sm:$0xff]  ;;  %v822_v32 = vld [vmem:[#allocation3 + $0x68] sm:$0xff]  ;;  %v141_v40 = vsub.s32 0, %v832_v39  ;;  %s648_s3 = scalar_lea.vmem %s575_s2, 128  ;;  %p653_p3 = scmp.lt.s32.totalorder %s575_s2, %s575_s2 }
  0x30   :  { %v101_v30 = vmul.f32 %v589_v5, %v816_v27  ;;  %v102_v31 = vmul.f32 %v589_v5, %v818_v29  ;;  %v824_v33 = vld [vmem:[#allocation3 + $0x70] sm:$0xff]  ;;  %v103_v34 = vmul.f32 %v589_v5, %v822_v32  ;;  %v828_v36 = vld [vmem:[#allocation3 + $0x78] sm:$0xff]  ;;  %v145_v45 = vsub.s32 1, %v832_v39  ;;  %p649_p2 = scmp.ne.s32.totalorder %s575_s2, %s648_s3  ;;  %p654_p4 = scmp.lt.s32.totalorder %s648_s3, %s648_s3 }
  0x31   :  { %v104_v35 = vmul.f32 %v589_v5, %v824_v33  ;;  %v105_v37 = vmul.f32 %v589_v5, %v828_v36  ;;  %v149_v53 = vsub.s32 2, %v832_v39  ;;  %v161_v58 = vsub.s32 5, %v832_v39 }
  0x32   :  { %106 = vadd.xlane.f32.xlu0 %v90_v9  ;;  %v153_v61 = vsub.s32 3, %v832_v39  ;;  %v165_v63 = vsub.s32 6, %v832_v39  ;;  %v169_v9 = vsub.s32 7, %v832_v39  ;;  %vm341_vm4 = vcmask 1044484   ;;  %p655_p5 = por %p654_p4, %p653_p3 }
  0x33   :  { %110 = vadd.xlane.f32.xlu1 %v92_v10  ;;  %vm343_vm5 = vcmask 1045509   ;;  %vm345_vm6 = vcmask 1046534   ;;  %vm347_vm7 = vcmask 1047559   ;;  %vm364_vm9 = vcmask 130048  }
  0x34   :  { %p656_p6 = pnand %p655_p5, %p649_p2 }
  0x36   :  { %112 = vadd.xlane.f32.xlu0 %v93_v13 }
  0x37   :  { %114 = vadd.xlane.f32.xlu1 %v94_v14 }
  0x3a   :  { %116 = vadd.xlane.f32.xlu0 %v95_v17  ;;  %v157_v17 = vsub.s32 4, %v832_v39 }
  0x3b   :  { %118 = vadd.xlane.f32.xlu1 %v96_v18 }
  0x3e   :  { %120 = vadd.xlane.f32.xlu0 %v97_v21 }
  0x3f   :  { %122 = vadd.xlane.f32.xlu1 %v98_v22 }
  0x42   :  { %124 = vadd.xlane.f32.xlu0 %v99_v25 }
  0x43   :  { %126 = vadd.xlane.f32.xlu1 %v100_v26 }
  0x46   :  { %128 = vadd.xlane.f32.xlu0 %v101_v30 }
  0x47   :  { %130 = vadd.xlane.f32.xlu1 %v102_v31  ;;  %v590_v31 = vld [vmem:[#allocation2] ss:$0 sm:$0xff] }
  0x4a   :  { %132 = vadd.xlane.f32.xlu0 %v103_v34 }
  0x4b   :  { %134 = vadd.xlane.f32.xlu1 %v104_v35 }
  0x4e   :  { %136 = vadd.xlane.f32.xlu0 %v105_v37 }
  0xbb   :  { %v82_v41 = vpop.xlane.xlu0 %81 }
  0xbc   :  { %v142_v42 = vrot.slane %v82_v41, %v141_v40  ;;  %v109_v43 = vpop.xlane.xlu1 %108  ;;  %v146_v49 = vrot.slane %v82_v41, %v145_v45  ;;  %v150_v56 = vrot.slane %v82_v41, %v149_v53  ;;  %v162_v62 = vrot.slane %v82_v41, %v161_v58 }
  0xbd   :  { %v154_v5 = vrot.slane %v82_v41, %v153_v61  ;;  %v166_v8 = vrot.slane %v82_v41, %v165_v63  ;;  %v170_v21 = vrot.slane %v82_v41, %v169_v9  ;;  %v158_v28 = vrot.slane %v82_v41, %v157_v17 }
  0xbe   :  { %v180_v44 = vadd.f32 %v142_v42, %v109_v43 }
  0xbf   :  { %v107_v46 = vpop.xlane.xlu0 %106 }
  0xc0   :  { %v111_v47 = vpop.xlane.xlu1 %110  ;;  %v179_v48 = vadd.f32 %v142_v42, %v107_v46  ;;  %215 = vperm.xlu0 %599, %v180_v44  }
  0xc1   :  { %v181_v50 = vadd.f32 %v146_v49, %v111_v47 }
  0xc2   :  { %212 = vperm.xlu1 %598, %v179_v48  }
  0xc3   :  { %v113_v52 = vpop.xlane.xlu0 %112 }
  0xc4   :  { %v115_v51 = vpop.xlane.xlu1 %114  ;;  %v182_v54 = vadd.f32 %v146_v49, %v113_v52 }
  0xc5   :  { %v183_v59 = vadd.f32 %v150_v56, %v115_v51 }
  0xc6   :  { %218 = vperm.xlu1 %598, %v181_v50  }
  0xc7   :  { %v117_v57 = vpop.xlane.xlu0 %116 }
  0xc8   :  { %v119_v55 = vpop.xlane.xlu1 %118  ;;  %v184_v0 = vadd.f32 %v150_v56, %v117_v57 }
  0xc9   :  { %v185_v10 = vadd.f32 %v154_v5, %v119_v55 }
  0xca   :  { %221 = vperm.xlu1 %598, %v182_v54   ;;  %v260_v54 = vand.u32 127, %v139_v38 }
  0xcb   :  { %v121_v2 = vpop.xlane.xlu0 %120 }
  0xcc   :  { %v123_v60 = vpop.xlane.xlu1 %122  ;;  %v186_v22 = vadd.f32 %v154_v5, %v121_v2  ;;  %v265_v57 = vadd.s32 4294967288, %v260_v54 }
  0xcd   :  { %v187_v30 = vadd.f32 %v158_v28, %v123_v60 }
  0xce   :  { %224 = vperm.xlu1 %598, %v183_v59  }
  0xcf   :  { %v125_v18 = vpop.xlane.xlu0 %124 }
  0xd0   :  { %v127_v1 = vpop.xlane.xlu1 %126  ;;  %v188_v35 = vadd.f32 %v158_v28, %v125_v18 }
  0xd1   :  { %v189_v4 = vadd.f32 %v162_v62, %v127_v1 }
  0xd2   :  { %227 = vperm.xlu1 %598, %v184_v0   ;;  %v263_v0 = vsub.s32 %v260_v54, %v832_v39 }
  0xd3   :  { %242 = vperm.xlu0 %599, %v189_v4   ;;  %v129_v34 = vpop.xlane.xlu0 %128 }
  0xd4   :  { %v131_v13 = vpop.xlane.xlu1 %130  ;;  %v190_v42 = vadd.f32 %v162_v62, %v129_v34  ;;  %v268_v62 = vsub.s32 %v265_v57, %v832_v39 }
  0xd5   :  { %v191_v14 = vadd.f32 %v166_v8, %v131_v13 }
  0xd6   :  { %230 = vperm.xlu1 %598, %v185_v10  }
  0xd7   :  { %248 = vperm.xlu0 %599, %v191_v14   ;;  %v133_v37 = vpop.xlane.xlu0 %132 }
  0xd8   :  { %v135_v25 = vpop.xlane.xlu1 %134  ;;  %v192_v43 = vadd.f32 %v166_v8, %v133_v37 }
  0xd9   :  { %v193_v26 = vadd.f32 %v170_v21, %v135_v25 }
  0xda   :  { %233 = vperm.xlu1 %598, %v186_v22  }
  0xdb   :  { %254 = vperm.xlu0 %599, %v193_v26   ;;  %v137_v44 = vpop.xlane.xlu0 %136 }
  0xdc   :  { %v194_v46 = vadd.f32 %v170_v21, %v137_v44 }
  0xde   :  { %236 = vperm.xlu1 %598, %v187_v30  }
  0xdf   :  { %358 = vperm.xlu0 %599, %v590_v31  }
  0xe2   :  { %239 = vperm.xlu1 %598, %v188_v35  }
  0xe6   :  { %245 = vperm.xlu1 %598, %v190_v42  }
  0xea   :  { %251 = vperm.xlu1 %598, %v192_v43  }
  0xee   :  { %257 = vperm.xlu1 %598, %v194_v46  }
 0x13f   :  { %v216_v55 = vpop.permute.xlu0 %215 }
 0x140   :  { %v269_v18 = vrot.slane %v216_v55, %v268_v62 }
 0x141   :  { %v213_v47 = vpop.permute.xlu1 %212 }
 0x142   :  { %v264_v8 = vrot.slane %v213_v47, %v263_v0 }
 0x144   :  { %v271_v31 = vsel %vm270_vm0, %v269_v18, %v264_v8 }
 0x145   :  { %v219_v48 = vpop.permute.xlu1 %218 }
 0x146   :  { %v275_v10 = vrot.slane %v219_v48, %v263_v0 }
 0x149   :  { %v222_v41 = vpop.permute.xlu1 %221 }
 0x14a   :  { %v279_v1 = vrot.slane %v222_v41, %v268_v62 }
 0x14c   :  { %v280_v21 = vsel %vm270_vm0, %v279_v1, %v275_v10 }
 0x14d   :  { %v225_v49 = vpop.permute.xlu1 %224  ;;  %v336_v42 = vsel %vm335_vm1, %v280_v21, %v271_v31 }
 0x14e   :  { %v284_v14 = vrot.slane %v225_v49, %v263_v0 }
 0x151   :  { %v228_v50 = vpop.permute.xlu1 %227 }
 0x152   :  { %v243_v59 = vpop.permute.xlu0 %242  ;;  %v288_v2 = vrot.slane %v228_v50, %v268_v62 }
 0x153   :  { %v311_v34 = vrot.slane %v243_v59, %v263_v0 }
 0x154   :  { %v289_v26 = vsel %vm270_vm0, %v288_v2, %v284_v14 }
 0x155   :  { %v231_v51 = vpop.permute.xlu1 %230  ;;  %v338_v47 = vsel %vm337_vm2, %v289_v26, %v336_v42 }
 0x156   :  { %v249_v4 = vpop.permute.xlu0 %248  ;;  %v293_v22 = vrot.slane %v231_v51, %v263_v0 }
 0x157   :  { %v320_v43 = vrot.slane %v249_v4, %v263_v0 }
 0x159   :  { %v234_v52 = vpop.permute.xlu1 %233 }
 0x15a   :  { %v297_v13 = vrot.slane %v234_v52, %v268_v62  ;;  %v255_v44 = vpop.permute.xlu0 %254 }
 0x15b   :  { %v329_v51 = vrot.slane %v255_v44, %v263_v0 }
 0x15c   :  { %v298_v35 = vsel %vm270_vm0, %v297_v13, %v293_v22 }
 0x15d   :  { %v237_v56 = vpop.permute.xlu1 %236  ;;  %v340_v41 = vsel %vm339_vm3, %v298_v35, %v338_v47 }
 0x15e   :  { %v302_v28 = vrot.slane %v237_v56, %v263_v0  ;;  %v71_v56 = vld [vmem:[#allocation6] sm:$0xff]  ;;  %v359_v2 = vpop.permute.xlu0 %358 }
 0x15f   :  { %vm362_vm8 = vcmp.ne.f32.partialorder %v71_v56, 0.0 }
 0x161   :  { %v240_v60 = vpop.permute.xlu1 %239 }
 0x162   :  { %v306_v38 = vrot.slane %v240_v60, %v268_v62 }
 0x164   :  { %v307_v46 = vsel %vm270_vm0, %v306_v38, %v302_v28 }
 0x165   :  { %v246_v5 = vpop.permute.xlu1 %245  ;;  %v342_v52 = vsel %vm341_vm4, %v307_v46, %v340_v41 }
 0x166   :  { %v315_v25 = vrot.slane %v246_v5, %v268_v62 }
 0x168   :  { %v316_v48 = vsel %vm270_vm0, %v315_v25, %v311_v34 }
 0x169   :  { %v252_v30 = vpop.permute.xlu1 %251  ;;  %v344_v55 = vsel %vm343_vm5, %v316_v48, %v342_v52 }
 0x16a   :  { %v324_v37 = vrot.slane %v252_v30, %v268_v62 }
 0x16c   :  { %v325_v49 = vsel %vm270_vm0, %v324_v37, %v320_v43 }
 0x16d   :  { %v258_v50 = vpop.permute.xlu1 %257  ;;  %v346_v57 = vsel %vm345_vm6, %v325_v49, %v344_v55 }
 0x16e   :  { %v333_v54 = vrot.slane %v258_v50, %v268_v62 }
 0x170   :  { %v334_v59 = vsel %vm270_vm0, %v333_v54, %v329_v51 }
 0x171   :  { %v348_v60 = vsel %vm347_vm7, %v334_v59, %v346_v57 }
 0x172   :  { %v350_v1 = vmul.f32 %v348_v60, %v71_v56 }
 0x174   :  { %v361_v4 = vadd.f32 %v359_v2, %v350_v1 }
 0x176   :  { %v363_v5 = vsel %vm362_vm8, %v361_v4, -1e+30 }
 0x177   :  { %v365_v0 = vsel %vm364_vm9, %v363_v5, -inf }
 0x178   :  { %366 = vmax.xlane.f32.xlu1 %v365_v0 }
 0x205   :  { %v367_v62 = vpop.xlane.xlu1 %366 }
 0x206   :  { %v368_v8 = vsub.f32 %v363_v5, %v367_v62 }
 0x208   :  { %v369_v10 = vmul.f32 1.442695, %v368_v8 }
 0x20a   :  { %600 = vpow2.f32 %v369_v10 }
 0x214   :  { %v601_v13 = vpop.eup %600 }
 0x215   :  { %v371_v14 = vsel %vm362_vm8, %v601_v13, 0.0 }
 0x216   :  { %v372_v38 = vsel %vm364_vm9, %v371_v14, 0.0 }
 0x217   :  { %373 = vadd.xlane.f32.xlu0 %v372_v38 }
 0x2a4   :  { %v374_v18 = vpop.xlane.xlu0 %373 }
 0x2a5   :  { %vm375_vm10 = vcmp.gt.f32.partialorder %v374_v18, 0.0 }
 0x2a6   :  { %v376_v21 = vsel %vm375_vm10, %v374_v18, 1.0 }
 0x2a7   :  { %602 = vrcp.f32 %v376_v21 }
 0x2b1   :  { %v603_v22 = vpop.eup %602 }
 0x2b2   :  { %v378_v25 = vmul.f32 %v603_v22, %v371_v14 }
 0x2b4   :  { %v380_v26 = vmul.f32 %v378_v25, %v71_v56  ;;  %379 = vst.msk [vmem:[#allocation9] sm:$0xff] %vm364_vm9, %v378_v25 }
 0x2b6   :  { %v384_v28 = vrot.slane %v380_v26, %v141_v40  ;;  %v395_v30 = vrot.slane %v380_v26, %v145_v45  ;;  %v406_v31 = vrot.slane %v380_v26, %v149_v53  ;;  %v417_v34 = vrot.slane %v380_v26, %v153_v61 }
 0x2b7   :  { %v428_v40 = vrot.slane %v380_v26, %v157_v17  ;;  %v439_v45 = vrot.slane %v380_v26, %v161_v58  ;;  %v450_v53 = vrot.slane %v380_v26, %v165_v63  ;;  %v461_v61 = vrot.slane %v380_v26, %v169_v9 }
 0x2b8   :  { %390 = vbcast.lane.b32.xlu1 %v384_v28, 264  ;;  %386 = vbcast.lane.b32.xlu0 %v384_v28, 256 }
 0x2bc   :  { %397 = vbcast.lane.b32.xlu1 %v395_v30, 256  ;;  %401 = vbcast.lane.b32.xlu0 %v395_v30, 264 }
 0x2c0   :  { %408 = vbcast.lane.b32.xlu1 %v406_v31, 256  ;;  %412 = vbcast.lane.b32.xlu0 %v406_v31, 264 }
 0x2c4   :  { %419 = vbcast.lane.b32.xlu1 %v417_v34, 256  ;;  %423 = vbcast.lane.b32.xlu0 %v417_v34, 264 }
 0x2c8   :  { %430 = vbcast.lane.b32.xlu1 %v428_v40, 256  ;;  %434 = vbcast.lane.b32.xlu0 %v428_v40, 264 }
 0x2cc   :  { %441 = vbcast.lane.b32.xlu1 %v439_v45, 256  ;;  %445 = vbcast.lane.b32.xlu0 %v439_v45, 264 }
 0x2d0   :  { %452 = vbcast.lane.b32.xlu1 %v450_v53, 256  ;;  %456 = vbcast.lane.b32.xlu0 %v450_v53, 264 }
 0x2d4   :  { %463 = vbcast.lane.b32.xlu1 %v461_v61, 256  ;;  %467 = vbcast.lane.b32.xlu0 %v461_v61, 264 }
 0x2d5   :  { %659 = shalt.err (!%p656_p6)
}
 0x2d6   :  { %s660_s11 = scalar_lea.hbm %s949_s7, 128 }
 0x2d7   :  { %p661_p7 = scmp.ne.s32.totalorder %s949_s7, %s660_s11  ;;  %p664_p8 = scmp.lt.u32.totalorder %s660_s11, %s949_s7 }
 0x2d9   :  { %p666_p9 = pnand %p664_p8, %p661_p7 }
 0x2db   :  { %669 = shalt.err (!%p666_p9)
}
 0x2dc   :  { %577 = dma.vmem_to_hbm [thread:$0]  %s575_s2, 128, %s949_s7, [#allocation10]  }
 0x2dd   :  { %s706_s7 = smov [#allocation8]  }
 0x2de   :  { %s564_s17 = sshll.u32 %s706_s7, 4  ;;  %s565_s17 = int_to_ptr.vmem [resolvable:$true] %s564_s17 }
 0x2df   :  { %s670_s18 = scalar_lea.vmem %s565_s17, 128  ;;  %p675_p11 = scmp.lt.s32.totalorder %s565_s17, %s565_s17 }
 0x2e0   :  { %p671_p10 = scmp.ne.s32.totalorder %s565_s17, %s670_s18  ;;  %p676_p12 = scmp.lt.s32.totalorder %s670_s18, %s670_s18 }
 0x2e2   :  { %p677_p13 = por %p676_p12, %p675_p11 }
 0x2e4   :  { %p678_p0 = pnand %p677_p13, %p671_p10 }
 0x32a   :  { %v391_v39 = vpop.permute.xlu1 %390  ;;  %v387_v58 = vpop.permute.xlu0 %386 }
 0x32b   :  { %v470_v37 = vmul.f32 %v391_v39, %v780_v3  ;;  %v469_v42 = vmul.f32 %v387_v58, %v787_v7 }
 0x32d   :  { %v485_v41 = vadd.f32 %v470_v37, %v469_v42 }
 0x32e   :  { %v398_v63 = vpop.permute.xlu1 %397  ;;  %v402_v9 = vpop.permute.xlu0 %401 }
 0x32f   :  { %v471_v17 = vmul.f32 %v398_v63, %v785_v6  ;;  %v472_v35 = vmul.f32 %v402_v9, %v792_v11  ;;  %v486_v54 = vrot.slane %v485_v41, 4 }
 0x331   :  { %v492_v48 = vadd.f32 %v472_v35, %v471_v17  ;;  %v487_v1 = vadd.f32 %v486_v54, %v485_v41 }
 0x332   :  { %v409_v43 = vpop.permute.xlu1 %408  ;;  %v413_v44 = vpop.permute.xlu0 %412 }
 0x333   :  { %v473_v46 = vmul.f32 %v409_v43, %v794_v12  ;;  %v474_v47 = vmul.f32 %v413_v44, %v798_v15  ;;  %v493_v11 = vrot.slane %v492_v48, 4  ;;  %v488_v13 = vrot.slane %v487_v1, 2 }
 0x335   :  { %v499_v49 = vadd.f32 %v474_v47, %v473_v46  ;;  %v494_v59 = vadd.f32 %v493_v11, %v492_v48  ;;  %v489_v31 = vadd.f32 %v488_v13, %v487_v1 }
 0x336   :  { %v420_v50 = vpop.permute.xlu1 %419  ;;  %v424_v51 = vpop.permute.xlu0 %423 }
 0x337   :  { %v475_v52 = vmul.f32 %v420_v50, %v800_v16  ;;  %v476_v6 = vmul.f32 %v424_v51, %v804_v19  ;;  %v500_v3 = vrot.slane %v499_v49, 4  ;;  %v495_v8 = vrot.slane %v494_v59, 2 }
 0x338   :  { %v490_v37 = vrot.slane %v489_v31, 1 }
 0x339   :  { %v506_v55 = vadd.f32 %v476_v6, %v475_v52  ;;  %v501_v2 = vadd.f32 %v500_v3, %v499_v49  ;;  %v496_v28 = vadd.f32 %v495_v8, %v494_v59 }
 0x33a   :  { %v431_v7 = vpop.permute.xlu1 %430  ;;  %v435_v56 = vpop.permute.xlu0 %434 }
 0x33b   :  { %v477_v57 = vmul.f32 %v431_v7, %v806_v20  ;;  %v478_v12 = vmul.f32 %v435_v56, %v810_v23  ;;  %v507_v15 = vrot.slane %v506_v55, 4  ;;  %v502_v14 = vrot.slane %v501_v2, 2 }
 0x33d   :  { %v513_v60 = vadd.f32 %v478_v12, %v477_v57  ;;  %v508_v16 = vadd.f32 %v507_v15, %v506_v55 }
 0x33e   :  { %v442_v4 = vpop.permute.xlu1 %441  ;;  %v446_v5 = vpop.permute.xlu0 %445 }
 0x33f   :  { %v514_v0 = vrot.slane %v513_v60, 4  ;;  %v479_v19 = vmul.f32 %v442_v4, %v812_v24  ;;  %v480_v62 = vmul.f32 %v446_v5, %v816_v27  ;;  %v509_v18 = vrot.slane %v508_v16, 2 }
 0x340   :  { %v503_v24 = vadd.f32 %v502_v14, %v501_v2 }
 0x341   :  { %v515_v10 = vadd.f32 %v514_v0, %v513_v60  ;;  %v520_v20 = vadd.f32 %v480_v62, %v479_v19  ;;  %v510_v45 = vadd.f32 %v509_v18, %v508_v16 }
 0x342   :  { %v453_v38 = vpop.permute.xlu1 %452  ;;  %v457_v23 = vpop.permute.xlu0 %456  ;;  %v504_v17 = vrot.slane %v503_v24, 1 }
 0x343   :  { %v481_v21 = vmul.f32 %v453_v38, %v818_v29  ;;  %v482_v22 = vmul.f32 %v457_v23, %v822_v32  ;;  %v516_v25 = vrot.slane %v515_v10, 2  ;;  %v521_v26 = vrot.slane %v520_v20, 4 }
 0x344   :  { %v497_v29 = vrot.slane %v496_v28, 1  ;;  %v511_v42 = vrot.slane %v510_v45, 1  ;;  %v505_v50 = vadd.f32 %v504_v17, %v503_v24 }
 0x345   :  { %v527_v30 = vadd.f32 %v482_v22, %v481_v21  ;;  %v522_v34 = vadd.f32 %v521_v26, %v520_v20  ;;  %v517_v58 = vadd.f32 %v516_v25, %v515_v10 }
 0x346   :  { %v464_v27 = vpop.permute.xlu1 %463  ;;  %v468_v40 = vpop.permute.xlu0 %467  ;;  %v498_v47 = vadd.f32 %v497_v29, %v496_v28  ;;  %v512_v51 = vadd.f32 %v511_v42, %v510_v45 }
 0x347   :  { %v528_v53 = vrot.slane %v527_v30, 4  ;;  %v483_v61 = vmul.f32 %v464_v27, %v824_v33  ;;  %v484_v39 = vmul.f32 %v468_v40, %v828_v36  ;;  %v523_v63 = vrot.slane %v522_v34, 2 }
 0x348   :  { %v518_v46 = vrot.slane %v517_v58, 1  ;;  %v491_v33 = vadd.f32 %v490_v37, %v489_v31 }
 0x349   :  { %v529_v9 = vadd.f32 %v528_v53, %v527_v30  ;;  %v534_v32 = vadd.f32 %v484_v39, %v483_v61  ;;  %v524_v35 = vadd.f32 %v523_v63, %v522_v34 }
 0x34a   :  { %v519_v6 = vadd.f32 %v518_v46, %v517_v58  ;;  %v549_v11 = vsel %vm335_vm1, %v498_v47, %v491_v33 }
 0x34b   :  { %v530_v43 = vrot.slane %v529_v9, 2  ;;  %v535_v44 = vrot.slane %v534_v32, 4  ;;  %v525_v48 = vrot.slane %v524_v35, 1  ;;  %v550_v55 = vsel %vm337_vm2, %v505_v50, %v549_v11 }
 0x34c   :  { %v551_v57 = vsel %vm339_vm3, %v512_v51, %v550_v55 }
 0x34d   :  { %v531_v41 = vadd.f32 %v530_v43, %v529_v9  ;;  %v536_v49 = vadd.f32 %v535_v44, %v534_v32  ;;  %v526_v54 = vadd.f32 %v525_v48, %v524_v35  ;;  %v552_v12 = vsel %vm341_vm4, %v519_v6, %v551_v57 }
 0x34f   :  { %v532_v36 = vrot.slane %v531_v41, 1  ;;  %v537_v52 = vrot.slane %v536_v49, 2  ;;  %v553_v59 = vsel %vm343_vm5, %v526_v54, %v552_v12 }
 0x351   :  { %v538_v3 = vadd.f32 %v537_v52, %v536_v49  ;;  %v533_v7 = vadd.f32 %v532_v36, %v531_v41 }
 0x353   :  { %v539_v56 = vrot.slane %v538_v3, 1  ;;  %v554_v60 = vsel %vm345_vm6, %v533_v7, %v553_v59 }
 0x355   :  { %v540_v15 = vadd.f32 %v539_v56, %v538_v3 }
 0x357   :  { %v555_v1 = vsel %vm347_vm7, %v540_v15, %v554_v60 }
 0x358   :  { %557 = vst [vmem:[#allocation8] sm:$0xff] %v555_v1 }
 0x359   :  { %681 = shalt.err (!%p678_p0)
}
 0x35a   :  { %s682_s21 = scalar_lea.hbm %s948_s6, 128 }
 0x35b   :  { %p683_p1 = scmp.ne.s32.totalorder %s948_s6, %s682_s21  ;;  %p686_p2 = scmp.lt.u32.totalorder %s682_s21, %s948_s6 }
 0x35d   :  { %p688_p3 = pnand %p686_p2, %p683_p1 }
 0x35f   :  { %691 = shalt.err (!%p688_p3)
}
 0x360   :  { %567 = dma.vmem_to_hbm [thread:$0]  %s565_s17, 128, %s948_s6, [#allocation5]  }
 0x361   :  { %696 = dma.done.wait [#allocation5], 128  }
 0x362   :  { %697 = vsyncadd [#allocation5], 4294967168 }
 0x363   :  { %698 = dma.done.wait [#allocation10], 128  }
 0x364   :  { %699 = vsyncadd [#allocation10], 4294967168 }
 0x365   :  { %584 = vsyncpa [#allocation4], 1 }
 0x366   :  { %585 = vsyncpa [#allocation7], 1 }
 0x367   :  { %586 = vsyncpa [#allocation5], 1 }
 0x368   :  { %587 = vsyncpa [#allocation10], 1 }

</bundles_post_ra>
